<compile_context>
chip_gen: v7x
topology: tpu7x:2x2x1
jax: 0.10.0
libtpu: 0.0.40
codegen_flags: <defaults>
</compile_context>

<pallas_src>
import functools

import numpy as np
import jax
import jax.numpy as jnp
from jax import lax
from jax.experimental import pallas as pl
from jax.experimental.pallas import tpu as pltpu


# ----------------------------------------------------------------------------
# Single fused Pallas kernel
# ----------------------------------------------------------------------------

def _rowsum(x):
    """Sum over the two trailing dims, keepdims, via two safe 1-axis reduces."""
    return jnp.sum(jnp.sum(x, axis=2, keepdims=True), axis=1, keepdims=True)


def _fused_loss_kernel(t_ref, y_ref, flow_ref, mask_ref,
                       w1_ref, z1_ref, w2_ref, z2_ref, o_ref,
                       *, w, hyper_1, hyper_2, hyper_3, hyper_4):
    f32 = jnp.float32

    # ---- similarity_loss: per-row Pearson correlation (two-pass) -----------
    t = t_ref[...].astype(f32)                     # (B, N//128, 128) packed
    yv = y_ref[...].astype(f32)
    inv_n = 1.0 / float(t.shape[1] * t.shape[2])
    m_t = _rowsum(t) * inv_n                       # (B,1,1)
    m_y = _rowsum(yv) * inv_n
    ct = t - m_t
    cy = yv - m_y
    var_t = _rowsum(ct * ct) * inv_n               # (B,1,1)
    var_y = _rowsum(cy * cy) * inv_n
    cov = _rowsum(ct * cy) * inv_n
    # Reference: cov / sqrt((var1+1e-6)*(var2+1e-6));  rsqrt -> EUP slot.
    r = cov * lax.rsqrt((var_t + 1e-6) * (var_y + 1e-6))
    ncc = jnp.sum(1.0 - r)                         # torch.sum over batch rows

    # ---- gradient_loss(flow * s_mask, penalty='l2') -------------------------
    flw = flow_ref[...].astype(f32)                # (B, C, H*W) lane-dense
    msk = mask_ref[...].astype(f32)                # (B, 1, H*W)
    f = flw * msk                                  # single batched broadcast
    b, c, hw = f.shape
    h = hw // w
    # Row-major flattened HW: dy pairs (k, k+w) are always valid (same image,
    # adjacent rows) -> no mask needed. dx pairs (k, k+1) are valid iff the
    # left element is not the last column of its row.
    dx = f[:, :, 1:] - f[:, :, :-1]                # (B, C, HW-1)
    dy = f[:, :, w:] - f[:, :, :-w]                # (B, C, (H-1)*W)
    col = lax.broadcasted_iota(jnp.int32, (1, 1, hw - 1), 2)
    dx_valid = (col % w) != (w - 1)
    sum_dx2 = jnp.sum(jnp.where(dx_valid, dx * dx, 0.0))
    sum_dy2 = jnp.sum(dy * dy)
    grad = 0.5 * (sum_dx2 / float(b * c * h * (w - 1))
                  + sum_dy2 / float(b * c * (h - 1) * w))

    # ---- multi-scale L1 (F.l1_loss, reduction='mean') -----------------------
    l1_1 = jnp.mean(jnp.abs(w1_ref[...].astype(f32) - z1_ref[...].astype(f32)))
    l1_2 = jnp.mean(jnp.abs(w2_ref[...].astype(f32) - z2_ref[...].astype(f32)))
    multi = hyper_3 * l1_1 + hyper_4 * l1_2

    # ---- combine; write one lane-dense (1,128) row (no scalar stores) ------
    total = multi + hyper_1 * ncc + hyper_2 * grad
    lane = lax.broadcasted_iota(jnp.int32, (1, 128), 1)
    o_ref[...] = jnp.where(lane == 0, total,
                           jnp.where(lane == 1, ncc,
                                     jnp.where(lane == 2, grad, 0.0)))


def _flat_rows(x):
    """Flatten to a lane-dense 2D slab (no dtype cast; cast happens in-kernel)."""
    m = int(np.prod(x.shape))
    if m % 128 == 0:
        return x.reshape(m // 128, 128)
    return x.reshape(1, m)


def _fused_losses(tgt, y, flow, s_mask, warped1, z1_tgt, warped2, z2_tgt,
                  hyper_1, hyper_2, hyper_3, hyper_4):
    b = tgt.shape[0]
    n = int(np.prod(tgt.shape[1:]))
    bf, cf, h, w = flow.shape

    def pack_rows(x):
        # (B, N) -> (B, N//128, 128) for full (8,128) vreg packing when possible.
        if n % 128 == 0:
            return x.reshape(b, n // 128, 128)
        return x.reshape(b, 1, n)

    kernel = functools.partial(
        _fused_loss_kernel, w=w,
        hyper_1=hyper_1, hyper_2=hyper_2, hyper_3=hyper_3, hyper_4=hyper_4)

    out = pl.pallas_call(
        kernel,
        out_shape=jax.ShapeDtypeStruct((1, 128), jnp.float32),
        in_specs=[pl.BlockSpec(memory_space=pltpu.MemorySpace.VMEM)] * 8,
        out_specs=pl.BlockSpec(memory_space=pltpu.MemorySpace.VMEM),
    )(
        pack_rows(tgt), pack_rows(y),
        flow.reshape(bf, cf, h * w),
        s_mask.reshape(bf, 1, h * w),          # NOT pre-broadcast along C
        _flat_rows(warped1), _flat_rows(z1_tgt),
        _flat_rows(warped2), _flat_rows(z2_tgt),
    )
    return out[0, 0], out[0, 1], out[0, 2]


# ----------------------------------------------------------------------------
# Plain-JAX glue (voxelmorph-style ResizeTransform / SpatialTransformer)
# ----------------------------------------------------------------------------
# TODO(synk): ResizeTransform / SpatialTransformer definitions are not in the
# source file; standard voxelmorph semantics are assumed (bilinear,
# align_corners=True, zero padding, output scaled by 1/vel_resize).

def resize_transform(x, vel_resize):
    factor = 1.0 / float(vel_resize)
    b, c, h, w = x.shape
    oh, ow = h // vel_resize, w // vel_resize
    ys = jnp.linspace(0.0, h - 1.0, oh)
    xs = jnp.linspace(0.0, w - 1.0, ow)
    y0 = jnp.floor(ys).astype(jnp.int32)
    x0 = jnp.floor(xs).astype(jnp.int32)
    y1 = jnp.minimum(y0 + 1, h - 1)
    x1 = jnp.minimum(x0 + 1, w - 1)
    wy = (ys - y0.astype(jnp.float32)).reshape(1, 1, oh, 1)
    wx = (xs - x0.astype(jnp.float32)).reshape(1, 1, 1, ow)
    rows = x[:, :, y0, :] * (1.0 - wy) + x[:, :, y1, :] * wy
    out = rows[:, :, :, x0] * (1.0 - wx) + rows[:, :, :, x1] * wx
    return out * factor


def spatial_transform(src, flow):
    """Bilinear warp: sample src at (identity grid + flow), zero padding."""
    # TODO(synk): assumes flow[:,0]=row / flow[:,1]=col displacement in voxels
    # (voxelmorph convention); verify against the reference SpatialTransformer.
    b, c, h, w = src.shape
    gy, gx = jnp.meshgrid(jnp.arange(h, dtype=jnp.float32),
                          jnp.arange(w, dtype=jnp.float32), indexing="ij")
    sy = gy[None] + flow[:, 0]
    sx = gx[None] + flow[:, 1]
    y0f = jnp.floor(sy)
    x0f = jnp.floor(sx)
    src_flat = src.reshape(b, c, h * w)

    def tap(yf, xf):
        valid = (yf >= 0) & (yf <= h - 1) & (xf >= 0) & (xf <= w - 1)
        yc = jnp.clip(yf, 0, h - 1).astype(jnp.int32)
        xc = jnp.clip(xf, 0, w - 1).astype(jnp.int32)
        idx = (yc * w + xc).reshape(b, 1, h * w)
        idx = jnp.broadcast_to(idx, src_flat.shape)
        vals = jnp.take_along_axis(src_flat, idx, axis=2).reshape(b, c, h, w)
        return vals * valid.astype(src.dtype)[:, None]

    wy = (sy - y0f)[:, None]
    wx = (sx - x0f)[:, None]
    return (tap(y0f, x0f) * (1.0 - wy) * (1.0 - wx)
            + tap(y0f, x0f + 1.0) * (1.0 - wy) * wx
            + tap(y0f + 1.0, x0f) * wy * (1.0 - wx)
            + tap(y0f + 1.0, x0f + 1.0) * wy * wx)


# ----------------------------------------------------------------------------
# LossFunctionAddMask.forward
# ----------------------------------------------------------------------------
# TODO(synk): the reference multi_loss.__init__ builds a pretrained VGG19
# (VGGLoss) that is never used in forward; omitted here (no checkpoint).

def loss_function_add_mask(y, tgt, src, flow, flow1, flow2, t_mask, s_mask):
    del t_mask  # unused in the reference forward
    hyper_1, hyper_2, hyper_3, hyper_4 = 10.0, 15.0, 3.2, 0.8

    # Multi-scale resize + warp in plain JAX (gather-based); their L1
    # reductions are folded into the fused Pallas kernel.
    z1_tgt = resize_transform(tgt, 2)
    z1_src = resize_transform(src, 2)
    warped1 = spatial_transform(z1_src, flow1)
    z2_tgt = resize_transform(tgt, 4)
    z2_src = resize_transform(src, 4)
    warped2 = spatial_transform(z2_src, flow2)

    loss, ncc, grad = _fused_losses(tgt, y, flow, s_mask,
                                    warped1, z1_tgt, warped2, z2_tgt,
                                    hyper_1, hyper_2, hyper_3, hyper_4)
    return loss, ncc, grad


if __name__ == "__main__":
    key = jax.random.PRNGKey(0)
    ks = jax.random.split(key, 8)
    B, C, H, W = 2, 1, 16, 16

    y_img = jax.random.uniform(ks[0], (B, C, H, W), jnp.float32)
    tgt = jax.random.uniform(ks[1], (B, C, H, W), jnp.float32)
    src = jax.random.uniform(ks[2], (B, C, H, W), jnp.float32)
    flow = jax.random.normal(ks[3], (B, 2, H, W), jnp.float32)
    flow1 = jax.random.normal(ks[4], (B, 2, H // 2, W // 2), jnp.float32)
    flow2 = jax.random.normal(ks[5], (B, 2, H // 4, W // 4), jnp.float32)
    t_mask = (jax.random.uniform(ks[6], (B, 1, H, W)) > 0.5).astype(jnp.float32)
    s_mask = (jax.random.uniform(ks[7], (B, 1, H, W)) > 0.5).astype(jnp.float32)

    fn = jax.jit(loss_function_add_mask)
    loss, ncc, grad = fn(y_img, tgt, src, flow, flow1, flow2, t_mask, s_mask)
    jax.block_until_ready((loss, ncc, grad))
    print("KERNEL_OK")
</pallas_src>

<mosaic_0001>
module attributes {stable_mosaic.version = 11 : i64} {
  func.func @_fused_loss_kernel(%arg0: memref<2x2x128xf32, #tpu.memory_space<vmem>>, %arg1: memref<2x2x128xf32, #tpu.memory_space<vmem>>, %arg2: memref<2x2x256xf32, #tpu.memory_space<vmem>>, %arg3: memref<2x1x256xf32, #tpu.memory_space<vmem>>, %arg4: memref<1x128xf32, #tpu.memory_space<vmem>>, %arg5: memref<1x128xf32, #tpu.memory_space<vmem>>, %arg6: memref<1x32xf32, #tpu.memory_space<vmem>>, %arg7: memref<1x32xf32, #tpu.memory_space<vmem>>, %arg8: memref<1x128xf32, #tpu.memory_space<vmem>>) attributes {dimension_semantics = [], scalar_prefetch = 0 : i64, scratch_operands = 0 : i64, tpu.core_type = #tpu.core_type<tc>} {
    %c0 = arith.constant 0 : index
    %c0_0 = arith.constant 0 : index
    %c0_1 = arith.constant 0 : index
    %0 = vector.load %arg0[%c0, %c0_0, %c0_1] : memref<2x2x128xf32, #tpu.memory_space<vmem>>, vector<2x2x128xf32>
    %c0_2 = arith.constant 0 : index
    %c0_3 = arith.constant 0 : index
    %c0_4 = arith.constant 0 : index
    %1 = vector.load %arg1[%c0_2, %c0_3, %c0_4] : memref<2x2x128xf32, #tpu.memory_space<vmem>>, vector<2x2x128xf32>
    %cst = arith.constant dense<0.000000e+00> : vector<2x2xf32>
    %2 = vector.multi_reduction <add>, %0, %cst [2] : vector<2x2x128xf32> to vector<2x2xf32>
    %3 = vector.shape_cast %2 : vector<2x2xf32> to vector<2x2x1xf32>
    %cst_5 = arith.constant dense<0.000000e+00> : vector<2x1xf32>
    %4 = vector.multi_reduction <add>, %3, %cst_5 [1] : vector<2x2x1xf32> to vector<2x1xf32>
    %5 = vector.shape_cast %4 : vector<2x1xf32> to vector<2x1x1xf32>
    %cst_6 = arith.constant 3.906250e-03 : f32
    %6 = vector.broadcast %cst_6 : f32 to vector<2x1x1xf32>
    %7 = arith.mulf %5, %6 : vector<2x1x1xf32>
    %cst_7 = arith.constant dense<0.000000e+00> : vector<2x2xf32>
    %8 = vector.multi_reduction <add>, %1, %cst_7 [2] : vector<2x2x128xf32> to vector<2x2xf32>
    %9 = vector.shape_cast %8 : vector<2x2xf32> to vector<2x2x1xf32>
    %cst_8 = arith.constant dense<0.000000e+00> : vector<2x1xf32>
    %10 = vector.multi_reduction <add>, %9, %cst_8 [1] : vector<2x2x1xf32> to vector<2x1xf32>
    %11 = vector.shape_cast %10 : vector<2x1xf32> to vector<2x1x1xf32>
    %cst_9 = arith.constant 3.906250e-03 : f32
    %12 = vector.broadcast %cst_9 : f32 to vector<2x1x1xf32>
    %13 = arith.mulf %11, %12 : vector<2x1x1xf32>
    %14 = vector.broadcast %7 : vector<2x1x1xf32> to vector<2x2x128xf32>
    %15 = arith.subf %0, %14 : vector<2x2x128xf32>
    %16 = vector.broadcast %13 : vector<2x1x1xf32> to vector<2x2x128xf32>
    %17 = arith.subf %1, %16 : vector<2x2x128xf32>
    %18 = arith.mulf %15, %15 : vector<2x2x128xf32>
    %cst_10 = arith.constant dense<0.000000e+00> : vector<2x2xf32>
    %19 = vector.multi_reduction <add>, %18, %cst_10 [2] : vector<2x2x128xf32> to vector<2x2xf32>
    %20 = vector.shape_cast %19 : vector<2x2xf32> to vector<2x2x1xf32>
    %cst_11 = arith.constant dense<0.000000e+00> : vector<2x1xf32>
    %21 = vector.multi_reduction <add>, %20, %cst_11 [1] : vector<2x2x1xf32> to vector<2x1xf32>
    %22 = vector.shape_cast %21 : vector<2x1xf32> to vector<2x1x1xf32>
    %cst_12 = arith.constant 3.906250e-03 : f32
    %23 = vector.broadcast %cst_12 : f32 to vector<2x1x1xf32>
    %24 = arith.mulf %22, %23 : vector<2x1x1xf32>
    %25 = arith.mulf %17, %17 : vector<2x2x128xf32>
    %cst_13 = arith.constant dense<0.000000e+00> : vector<2x2xf32>
    %26 = vector.multi_reduction <add>, %25, %cst_13 [2] : vector<2x2x128xf32> to vector<2x2xf32>
    %27 = vector.shape_cast %26 : vector<2x2xf32> to vector<2x2x1xf32>
    %cst_14 = arith.constant dense<0.000000e+00> : vector<2x1xf32>
    %28 = vector.multi_reduction <add>, %27, %cst_14 [1] : vector<2x2x1xf32> to vector<2x1xf32>
    %29 = vector.shape_cast %28 : vector<2x1xf32> to vector<2x1x1xf32>
    %cst_15 = arith.constant 3.906250e-03 : f32
    %30 = vector.broadcast %cst_15 : f32 to vector<2x1x1xf32>
    %31 = arith.mulf %29, %30 : vector<2x1x1xf32>
    %32 = arith.mulf %15, %17 : vector<2x2x128xf32>
    %cst_16 = arith.constant dense<0.000000e+00> : vector<2x2xf32>
    %33 = vector.multi_reduction <add>, %32, %cst_16 [2] : vector<2x2x128xf32> to vector<2x2xf32>
    %34 = vector.shape_cast %33 : vector<2x2xf32> to vector<2x2x1xf32>
    %cst_17 = arith.constant dense<0.000000e+00> : vector<2x1xf32>
    %35 = vector.multi_reduction <add>, %34, %cst_17 [1] : vector<2x2x1xf32> to vector<2x1xf32>
    %36 = vector.shape_cast %35 : vector<2x1xf32> to vector<2x1x1xf32>
    %cst_18 = arith.constant 3.906250e-03 : f32
    %37 = vector.broadcast %cst_18 : f32 to vector<2x1x1xf32>
    %38 = arith.mulf %36, %37 : vector<2x1x1xf32>
    %cst_19 = arith.constant 9.99999997E-7 : f32
    %39 = vector.broadcast %cst_19 : f32 to vector<2x1x1xf32>
    %40 = arith.addf %24, %39 : vector<2x1x1xf32>
    %cst_20 = arith.constant 9.99999997E-7 : f32
    %41 = vector.broadcast %cst_20 : f32 to vector<2x1x1xf32>
    %42 = arith.addf %31, %41 : vector<2x1x1xf32>
    %43 = arith.mulf %40, %42 : vector<2x1x1xf32>
    %44 = math.rsqrt %43 : vector<2x1x1xf32>
    %45 = arith.mulf %38, %44 : vector<2x1x1xf32>
    %cst_21 = arith.constant 1.000000e+00 : f32
    %46 = vector.broadcast %cst_21 : f32 to vector<2x1x1xf32>
    %47 = arith.subf %46, %45 : vector<2x1x1xf32>
    %48 = vector.shape_cast %47 : vector<2x1x1xf32> to vector<1x2x1x1xf32>
    %cst_22 = arith.constant dense<0.000000e+00> : vector<1xf32>
    %49 = vector.multi_reduction <add>, %48, %cst_22 [1, 2, 3] : vector<1x2x1x1xf32> to vector<1xf32>
    %50 = vector.shape_cast %49 : vector<1xf32> to vector<1x1x1x1xf32>
    %51 = vector.extract %50[0, 0, 0, 0] : f32 from vector<1x1x1x1xf32>
    %c0_23 = arith.constant 0 : index
    %c0_24 = arith.constant 0 : index
    %c0_25 = arith.constant 0 : index
    %52 = vector.load %arg2[%c0_23, %c0_24, %c0_25] : memref<2x2x256xf32, #tpu.memory_space<vmem>>, vector<2x2x256xf32>
    %c0_26 = arith.constant 0 : index
    %c0_27 = arith.constant 0 : index
    %c0_28 = arith.constant 0 : index
    %53 = vector.load %arg3[%c0_26, %c0_27, %c0_28] : memref<2x1x256xf32, #tpu.memory_space<vmem>>, vector<2x1x256xf32>
    %54 = vector.broadcast %53 : vector<2x1x256xf32> to vector<2x2x256xf32>
    %55 = arith.mulf %52, %54 : vector<2x2x256xf32>
    %56 = vector.extract_strided_slice %55 {offsets = [0, 0, 1], sizes = [2, 2, 255], strides = [1, 1, 1]} : vector<2x2x256xf32> to vector<2x2x255xf32>
    %57 = vector.extract_strided_slice %55 {offsets = [0, 0, 0], sizes = [2, 2, 255], strides = [1, 1, 1]} : vector<2x2x256xf32> to vector<2x2x255xf32>
    %58 = arith.subf %56, %57 : vector<2x2x255xf32>
    %59 = vector.extract_strided_slice %55 {offsets = [0, 0, 16], sizes = [2, 2, 240], strides = [1, 1, 1]} : vector<2x2x256xf32> to vector<2x2x240xf32>
    %60 = vector.extract_strided_slice %55 {offsets = [0, 0, 0], sizes = [2, 2, 240], strides = [1, 1, 1]} : vector<2x2x256xf32> to vector<2x2x240xf32>
    %61 = arith.subf %59, %60 : vector<2x2x240xf32>
    %62 = tpu.iota {dimensions = array<i32: 2>} : vector<1x1x255xi32>
    %c16_i32 = arith.constant 16 : i32
    %c0_i32 = arith.constant 0 : i32
    %63 = arith.cmpi eq, %c16_i32, %c0_i32 : i32
    %c1_i32 = arith.constant 1 : i32
    %64 = arith.select %63, %c1_i32, %c16_i32 : i32
    %65 = vector.broadcast %64 : i32 to vector<1x1x255xi32>
    %66 = arith.remsi %62, %65 : vector<1x1x255xi32>
    %c0_i32_29 = arith.constant 0 : i32
    %67 = vector.broadcast %c0_i32_29 : i32 to vector<1x1x255xi32>
    %68 = arith.cmpi ne, %66, %67 : vector<1x1x255xi32>
    %c0_i32_30 = arith.constant 0 : i32
    %69 = vector.broadcast %c0_i32_30 : i32 to vector<1x1x255xi32>
    %70 = arith.cmpi slt, %66, %69 : vector<1x1x255xi32>
    %c0_i32_31 = arith.constant 0 : i32
    %71 = arith.cmpi slt, %64, %c0_i32_31 : i32
    %72 = vector.broadcast %71 : i1 to vector<1x1x255xi1>
    %73 = vector.broadcast %72 : vector<1x1x255xi1> to vector<1x1x255xi1>
    %74 = arith.xori %70, %73 : vector<1x1x255xi1>
    %75 = arith.andi %74, %68 : vector<1x1x255xi1>
    %76 = vector.broadcast %64 : i32 to vector<1x1x255xi32>
    %77 = arith.addi %66, %76 : vector<1x1x255xi32>
    %78 = arith.select %75, %77, %66 : vector<1x1x255xi1>, vector<1x1x255xi32>
    %c15_i32 = arith.constant 15 : i32
    %79 = vector.broadcast %c15_i32 : i32 to vector<1x1x255xi32>
    %80 = arith.cmpi ne, %78, %79 : vector<1x1x255xi32>
    %81 = arith.mulf %58, %58 : vector<2x2x255xf32>
    %cst_32 = arith.constant 0.000000e+00 : f32
    %82 = vector.shape_cast %80 : vector<1x1x255xi1> to vector<1x1x255xi1>
    %83 = vector.broadcast %82 : vector<1x1x255xi1> to vector<2x2x255xi1>
    %84 = vector.broadcast %cst_32 : f32 to vector<2x2x255xf32>
    %85 = arith.select %83, %81, %84 : vector<2x2x255xi1>, vector<2x2x255xf32>
    %86 = vector.shape_cast %85 : vector<2x2x255xf32> to vector<1x2x2x255xf32>
    %cst_33 = arith.constant dense<0.000000e+00> : vector<1xf32>
    %87 = vector.multi_reduction <add>, %86, %cst_33 [1, 2, 3] : vector<1x2x2x255xf32> to vector<1xf32>
    %88 = vector.shape_cast %87 : vector<1xf32> to vector<1x1x1x1xf32>
    %89 = vector.extract %88[0, 0, 0, 0] : f32 from vector<1x1x1x1xf32>
    %90 = arith.mulf %61, %61 : vector<2x2x240xf32>
    %91 = vector.shape_cast %90 : vector<2x2x240xf32> to vector<1x2x2x240xf32>
    %cst_34 = arith.constant dense<0.000000e+00> : vector<1xf32>
    %92 = vector.multi_reduction <add>, %91, %cst_34 [1, 2, 3] : vector<1x2x2x240xf32> to vector<1xf32>
    %93 = vector.shape_cast %92 : vector<1xf32> to vector<1x1x1x1xf32>
    %94 = vector.extract %93[0, 0, 0, 0] : f32 from vector<1x1x1x1xf32>
    %cst_35 = arith.constant 9.600000e+02 : f32
    %95 = arith.divf %89, %cst_35 : f32
    %cst_36 = arith.constant 9.600000e+02 : f32
    %96 = arith.divf %94, %cst_36 : f32
    %97 = arith.addf %95, %96 : f32
    %cst_37 = arith.constant 5.000000e-01 : f32
    %98 = arith.mulf %cst_37, %97 : f32
    %c0_38 = arith.constant 0 : index
    %c0_39 = arith.constant 0 : index
    %99 = vector.load %arg4[%c0_38, %c0_39] : memref<1x128xf32, #tpu.memory_space<vmem>>, vector<1x128xf32>
    %c0_40 = arith.constant 0 : index
    %c0_41 = arith.constant 0 : index
    %100 = vector.load %arg5[%c0_40, %c0_41] : memref<1x128xf32, #tpu.memory_space<vmem>>, vector<1x128xf32>
    %101 = arith.subf %99, %100 : vector<1x128xf32>
    %102 = math.absf %101 : vector<1x128xf32>
    %103 = vector.shape_cast %102 : vector<1x128xf32> to vector<1x1x128xf32>
    %cst_42 = arith.constant dense<0.000000e+00> : vector<1xf32>
    %104 = vector.multi_reduction <add>, %103, %cst_42 [1, 2] : vector<1x1x128xf32> to vector<1xf32>
    %105 = vector.shape_cast %104 : vector<1xf32> to vector<1x1x1xf32>
    %106 = vector.extract %105[0, 0, 0] : f32 from vector<1x1x1xf32>
    %cst_43 = arith.constant 1.280000e+02 : f32
    %107 = arith.divf %106, %cst_43 : f32
    %c0_44 = arith.constant 0 : index
    %c0_45 = arith.constant 0 : index
    %108 = vector.load %arg6[%c0_44, %c0_45] : memref<1x32xf32, #tpu.memory_space<vmem>>, vector<1x32xf32>
    %c0_46 = arith.constant 0 : index
    %c0_47 = arith.constant 0 : index
    %109 = vector.load %arg7[%c0_46, %c0_47] : memref<1x32xf32, #tpu.memory_space<vmem>>, vector<1x32xf32>
    %110 = arith.subf %108, %109 : vector<1x32xf32>
    %111 = math.absf %110 : vector<1x32xf32>
    %112 = vector.shape_cast %111 : vector<1x32xf32> to vector<1x1x32xf32>
    %cst_48 = arith.constant dense<0.000000e+00> : vector<1xf32>
    %113 = vector.multi_reduction <add>, %112, %cst_48 [1, 2] : vector<1x1x32xf32> to vector<1xf32>
    %114 = vector.shape_cast %113 : vector<1xf32> to vector<1x1x1xf32>
    %115 = vector.extract %114[0, 0, 0] : f32 from vector<1x1x1xf32>
    %cst_49 = arith.constant 3.200000e+01 : f32
    %116 = arith.divf %115, %cst_49 : f32
    %cst_50 = arith.constant 3.200000e+00 : f32
    %117 = arith.mulf %cst_50, %107 : f32
    %cst_51 = arith.constant 8.000000e-01 : f32
    %118 = arith.mulf %cst_51, %116 : f32
    %119 = arith.addf %117, %118 : f32
    %cst_52 = arith.constant 1.000000e+01 : f32
    %120 = arith.mulf %cst_52, %51 : f32
    %121 = arith.addf %119, %120 : f32
    %cst_53 = arith.constant 1.500000e+01 : f32
    %122 = arith.mulf %cst_53, %98 : f32
    %123 = arith.addf %121, %122 : f32
    %124 = tpu.iota {dimensions = array<i32: 1>} : vector<1x128xi32>
    %c0_i32_54 = arith.constant 0 : i32
    %125 = vector.broadcast %c0_i32_54 : i32 to vector<1x128xi32>
    %126 = arith.cmpi eq, %124, %125 : vector<1x128xi32>
    %c1_i32_55 = arith.constant 1 : i32
    %127 = vector.broadcast %c1_i32_55 : i32 to vector<1x128xi32>
    %128 = arith.cmpi eq, %124, %127 : vector<1x128xi32>
    %c2_i32 = arith.constant 2 : i32
    %129 = vector.broadcast %c2_i32 : i32 to vector<1x128xi32>
    %130 = arith.cmpi eq, %124, %129 : vector<1x128xi32>
    %cst_56 = arith.constant 0.000000e+00 : f32
    %131 = vector.broadcast %98 : f32 to vector<1x128xf32>
    %132 = vector.broadcast %cst_56 : f32 to vector<1x128xf32>
    %133 = arith.select %130, %131, %132 : vector<1x128xi1>, vector<1x128xf32>
    %134 = vector.broadcast %51 : f32 to vector<1x128xf32>
    %135 = arith.select %128, %134, %133 : vector<1x128xi1>, vector<1x128xf32>
    %136 = vector.broadcast %123 : f32 to vector<1x128xf32>
    %137 = arith.select %126, %136, %135 : vector<1x128xi1>, vector<1x128xf32>
    %c0_57 = arith.constant 0 : index
    %c0_58 = arith.constant 0 : index
    %138 = vector.load %arg8[%c0_57, %c0_58] : memref<1x128xf32, #tpu.memory_space<vmem>>, vector<1x128xf32>
    tpu.vector_store %arg8[%c0_57, %c0_58], %137 {strides = array<i32>} : memref<1x128xf32, #tpu.memory_space<vmem>>, vector<1x128xf32>,
    return
  }
}

</mosaic_0001>

<bundles_post_ra>
// kernel: loss_function_add_mask.1
= control target key start
LH: loop header
LB: loop body
LE: loop exit
PB: predicated region body
PF: predicated region fallthrough
CT: control target
= control target key end

     0   :  { %vm33_vm0 = vcmask 1041408   ;;  %v185_v0 = vlaneseq  ;;  %v474_v8 = vmov 1983009808   ;;  %s476_s19 = smov 1   ;;  %vm242_vm1 = vcmask 130048   ;;  %s478_s20 = smov 127   ;;  %s665_s1 = inlined_call_operand.vmem [shape: f32[2,2,128], index: 1, kind: input, shape index: {}]   ;;  %s666_s0 = inlined_call_operand.vmem [shape: f32[2,2,128], index: 0, kind: input, shape index: {}]   ;;  %s667_s3 = inlined_call_operand.vmem [shape: f32[2,1,256], index: 3, kind: input, shape index: {}]   ;;  %s668_s2 = inlined_call_operand.vmem [shape: f32[2,2,256], index: 2, kind: input, shape index: {}]   ;;  %s669_s4 = inlined_call_operand.vmem [shape: f32[1,128], index: 4, kind: input, shape index: {}]   ;;  %s670_s5 = inlined_call_operand.vmem [shape: f32[1,128], index: 5, kind: input, shape index: {}]   ;;  %s671_s6 = inlined_call_operand.vmem [shape: f32[1,32], index: 6, kind: input, shape index: {}]   ;;  %s672_s7 = inlined_call_operand.vmem [shape: f32[1,32], index: 7, kind: input, shape index: {}]   ;;  %s673_s8 = inlined_call_operand.vmem [shape: f32[1,128], index: 8, kind: output, shape index: {}]  }
   0x1   :  { %v527_v1 = vld [vmem:[%s665_s1] sm:$0x3]  ;;  %v537_v3 = vld [vmem:[%s665_s1 + $0x2] sm:$0x3]  ;;  %v203_v9 = vunpack.c.l.s4 %v474_v8  ;;  %v180_v28 = vld [vmem:[%s668_s2 + $0x4] sm:$0xf] }
   0x2   :  { %v532_v2 = vld [vmem:[%s666_s0] sm:$0x3]  ;;  %v56_v4 = vsel %vm33_vm0, %v527_v1, 0.0  ;;  %v546_v6 = vld [vmem:[%s666_s0 + $0x2] sm:$0x3]  ;;  %v186_v7 = vshrl.u32 %v185_v0, 7 }
   0x3   :  { %v34_v5 = vsel %vm33_vm0, %v532_v2, 0.0  ;;  %57 = vadd.xlane.f32.xlu1 %v56_v4  ;;  %v59_v10 = vsel %vm33_vm0, %v537_v3, 0.0  ;;  %v37_v11 = vsel %vm33_vm0, %v546_v6, 0.0  ;;  %v181_v14 = vld [vmem:[%s667_s3] sm:$0x3]  ;;  %v204_v17 = vunpack.c.0.s8 %v203_v9 }
   0x4   :  { %35 = vadd.xlane.f32.xlu0 %v34_v5  ;;  %v187_v12 = vsub.s32 0, %v186_v7  ;;  %v191_v13 = vsub.s32 1, %v186_v7  ;;  %v182_v18 = vld [vmem:[%s667_s3 + $0x2] sm:$0x3]  ;;  %s475_s3 = smov 16   ;;  %vm229_vm2 = vcmask 7168  }
   0x5   :  { %v559_v20 = vsub.s32 %v204_v17, %v186_v7  ;;  %v179_v25 = vld [vmem:[%s668_s2] sm:$0xf]  ;;  %s477_s2 = smov 112   ;;  %vm310_vm3 = vcmask 1039360   ;;  %vm322_vm6 = vcmask 1033216   ;;  %vm366_vm7 = vcmask 916480  }
   0x6   :  { %v188_v15 = vrot.slane %v181_v14, %v187_v12  ;;  %v192_v16 = vrot.slane %v181_v14, %v191_v13  ;;  %v196_v21 = vrot.slane %v182_v18, %v187_v12  ;;  %v200_v22 = vrot.slane %v182_v18, %v191_v13 }
   0x7   :  { %60 = vadd.xlane.f32.xlu1 %v59_v10  ;;  %vm374_vm8 = vcmask 910336   ;;  %vm402_vm9 = vcmask 1040384   ;;  %vm166_vm10 = vcmask 0   ;;  %vm420_vm11 = vcmask 253952  }
   0x8   :  { %38 = vadd.xlane.f32.xlu0 %v37_v11  ;;  %v201_v19 = vcombine.low %v188_v15, %v192_v16  ;;  %v209_v24 = vcombine.low %v196_v21, %v200_v22 }
   0xa   :  { %v208_v23 = vrot.slane %v201_v19, %v559_v20  ;;  %v216_v27 = vrot.slane %v209_v24, %v559_v20 }
   0xc   :  { %v219_v26 = vmul.f32 %v208_v23, %v179_v25  ;;  %v569_v29 = vmul.f32 %v216_v27, %v180_v28 }
  0x18   :  { %236 = vrot.lane.b32.xlu1 %v219_v26, %s475_s3 }
  0x1c   :  { %225 = vrot.lane.b32.xlu1 %v569_v29, %s476_s19 }
  0x1e   :  { %223 = vrot.lane.b32.xlu0 %v219_v26, %s476_s19 }
  0x20   :  { %238 = vrot.lane.b32.xlu1 %v569_v29, %s475_s3 }
  0x90   :  { %v58_v30 = vpop.xlane.xlu1 %57 }
  0x91   :  { %v36_v31 = vpop.xlane.xlu0 %35  ;;  %v62_v44 = vsel %vm33_vm0, %v58_v30, 0.0 }
  0x92   :  { %v40_v38 = vsel %vm33_vm0, %v36_v31, 0.0  ;;  %v63_v47 = vrot.slane %v62_v44, 4 }
  0x93   :  { %v41_v41 = vrot.slane %v40_v38, 4 }
  0x94   :  { %v61_v32 = vpop.xlane.xlu1 %60  ;;  %v64_v52 = vadd.f32 %v63_v47, %v62_v44 }
  0x95   :  { %v39_v33 = vpop.xlane.xlu0 %38  ;;  %v42_v48 = vadd.f32 %v41_v41, %v40_v38  ;;  %v69_v51 = vsel %vm33_vm0, %v61_v32, 0.0 }
  0x96   :  { %v70_v54 = vrot.slane %v69_v51, 4  ;;  %v47_v56 = vsel %vm33_vm0, %v39_v33, 0.0  ;;  %v65_v57 = vrot.slane %v64_v52, 2 }
  0x97   :  { %v43_v53 = vrot.slane %v42_v48, 2  ;;  %v48_v61 = vrot.slane %v47_v56, 4 }
  0x98   :  { %v237_v34 = vpop.permute.xlu1 %236  ;;  %v71_v59 = vadd.f32 %v70_v54, %v69_v51  ;;  %v66_v62 = vadd.f32 %v65_v57, %v64_v52  ;;  %v608_v51 = vand.u32 127, %v185_v0 }
  0x99   :  { %v224_v35 = vpop.permute.xlu0 %223  ;;  %v240_v36 = vrot.slane %v237_v34, 6  ;;  %v44_v58 = vadd.f32 %v43_v53, %v42_v48  ;;  %v49_v5 = vadd.f32 %v48_v61, %v47_v56 }
  0x9a   :  { %v227_v37 = vrot.slane %v224_v35, 6  ;;  %v72_v4 = vrot.slane %v71_v59, 2  ;;  %v67_v7 = vrot.slane %v66_v62, 1  ;;  %v251_v53 = vadd.s32 128, %v608_v51 }
  0x9b   :  { %v243_v39 = vsel %vm242_vm1, %v240_v36, %v237_v34  ;;  %v45_v63 = vrot.slane %v44_v58, 1  ;;  %v50_v10 = vrot.slane %v49_v5, 2  ;;  %vm443_vm12 = vcmp.eq.s32.totalorder %v608_v51, 2 }
  0x9c   :  { %v230_v40 = vsel %vm229_vm2, %v227_v37, %v224_v35  ;;  %v247_v42 = vsub.f32 %v219_v26, %v243_v39  ;;  %v73_v9 = vadd.f32 %v72_v4, %v71_v59  ;;  %v68_v11 = vadd.f32 %v67_v7, %v66_v62 }
  0x9d   :  { %v234_v43 = vsub.f32 %v219_v26, %v230_v40  ;;  %v46_v8 = vadd.f32 %v45_v63, %v44_v58  ;;  %v51_v14 = vadd.f32 %v50_v10, %v49_v5  ;;  %v263_v56 = vand.u32 15, %v251_v53 }
  0x9e   :  { %v338_v45 = vmul.f32 %v247_v42, %v247_v42  ;;  %v74_v13 = vrot.slane %v73_v9, 1  ;;  %v76_v15 = vmul.f32 0.00390625, %v68_v11  ;;  %vm442_vm13 = vcmp.eq.s32.totalorder %v608_v51, 1 }
  0x9f   :  { %v278_v46 = vmul.f32 %v234_v43, %v234_v43  ;;  %v54_v12 = vmul.f32 0.00390625, %v46_v8  ;;  %v52_v18 = vrot.slane %v51_v14, 1  ;;  %vm618_vm5 = vcmp.ne.s32.totalorder %v263_v56, 15 }
  0xa0   :  { %v348_v49 = vrot.slane %v338_v45, %v559_v20  ;;  %v75_v16 = vadd.f32 %v74_v13, %v73_v9  ;;  %v80_v22 = vsub.f32 %v527_v1, %v76_v15  ;;  %vm441_vm14 = vcmp.eq.s32.totalorder %v608_v51, 0 }
  0xa1   :  { %v292_v50 = vrot.slane %v278_v46, %v559_v20  ;;  %v78_v17 = vsub.f32 %v532_v2, %v54_v12  ;;  %v53_v23 = vadd.f32 %v52_v18, %v51_v14  ;;  %v226_v2 = vpop.permute.xlu1 %225 }
  0xa2   :  { %358 = vrot.lane.b32.xlu1 %v348_v49, %s477_s2  ;;  %v349_v60 = vcombine.high %v348_v49, %v348_v49  ;;  %v77_v19 = vmul.f32 0.00390625, %v75_v16  ;;  %v106_v25 = vmul.f32 %v80_v22, %v80_v22  ;;  %v228_v1 = vrot.slane %v226_v2, 6 }
  0xa3   :  { %302 = vrot.lane.b32.xlu0 %v292_v50, %s478_s20  ;;  %v293_v55 = vcombine.high %v292_v50, %v292_v50  ;;  %v82_v21 = vmul.f32 %v78_v17, %v78_v17  ;;  %v55_v27 = vmul.f32 0.00390625, %v53_v23 }
  0xa4   :  { %v81_v26 = vsub.f32 %v537_v3, %v77_v19  ;;  %v108_v28 = vsel %vm33_vm0, %v106_v25, 0.0  ;;  %v231_v35 = vsel %vm229_vm2, %v228_v1, %v226_v2 }
  0xa5   :  { %v84_v24 = vsel %vm33_vm0, %v82_v21, 0.0  ;;  %v79_v31 = vsub.f32 %v546_v6, %v55_v27  ;;  %v235_v3 = vsub.f32 %v569_v29, %v231_v35  ;;  %v130_v6 = vmul.f32 %v80_v22, %v78_v17  ;;  %v239_v39 = vpop.permute.xlu1 %238 }
  0xa6   :  { %304 = vrot.lane.b32.xlu1 %v293_v55, %s478_s20  ;;  %v107_v30 = vmul.f32 %v81_v26, %v81_v26  ;;  %v241_v41 = vrot.slane %v239_v39, 6 }
  0xa7   :  { %v83_v33 = vmul.f32 %v79_v31, %v79_v31  ;;  %v279_v36 = vmul.f32 %v235_v3, %v235_v3  ;;  %v132_v40 = vsel %vm33_vm0, %v130_v6, 0.0  ;;  %v131_v42 = vmul.f32 %v81_v26, %v79_v31 }
  0xa8   :  { %v111_v32 = vsel %vm33_vm0, %v107_v30, 0.0  ;;  %v244_v43 = vsel %vm242_vm1, %v241_v41, %v239_v39 }
  0xa9   :  { %v87_v34 = vsel %vm33_vm0, %v83_v33, 0.0  ;;  %v300_v37 = vrot.slane %v279_v36, %v559_v20  ;;  %v135_v44 = vsel %vm33_vm0, %v131_v42, 0.0  ;;  %v248_v45 = vsub.f32 %v569_v29, %v244_v43 }
  0xaa   :  { %360 = vrot.lane.b32.xlu1 %v349_v60, %s477_s2  ;;  %v256_v29 = vand.u32 15, %v608_v51 }
  0xab   :  { %v301_v38 = vcombine.high %v300_v37, %v300_v37  ;;  %v339_v46 = vmul.f32 %v248_v45, %v248_v45 }
  0xac   :  { %vm614_vm4 = vcmp.ne.s32.totalorder %v256_v29, 15 }
  0xad   :  { %v356_v47 = vrot.slane %v339_v46, %v559_v20 }
  0xaf   :  { %v357_v48 = vcombine.high %v356_v47, %v356_v47 }
  0xc2   :  { %85 = vadd.xlane.f32.xlu0 %v84_v24 }
  0xc6   :  { %109 = vadd.xlane.f32.xlu0 %v108_v28 }
  0xca   :  { %112 = vadd.xlane.f32.xlu0 %v111_v32 }
  0xce   :  { %88 = vadd.xlane.f32.xlu1 %v87_v34 }
  0xdf   :  { %308 = vrot.lane.b32.xlu1 %v301_v38, %s478_s20 }
  0xe0   :  { %306 = vrot.lane.b32.xlu0 %v300_v37, %s478_s20 }
  0xff   :  { %133 = vadd.xlane.f32.xlu0 %v132_v40 }
 0x103   :  { %136 = vadd.xlane.f32.xlu1 %v135_v44 }
 0x114   :  { %364 = vrot.lane.b32.xlu1 %v357_v48, %s477_s2  ;;  %v605_v50 = vpop.permute.xlu1 %358 }
 0x115   :  { %362 = vrot.lane.b32.xlu0 %v356_v47, %s477_s2  ;;  %v303_v49 = vpop.permute.xlu0 %302 }
 0x118   :  { %v305_v54 = vpop.permute.xlu1 %304 }
 0x119   :  { %v311_v0 = vsel %vm310_vm3, %v303_v49, %v305_v54  ;;  %v318_v61 = vsel %vm618_vm5, %v305_v54, 0.0 }
 0x11a   :  { %v317_v60 = vsel %vm614_vm4, %v311_v0, 0.0  ;;  %v323_v4 = vsel %vm322_vm6, %v318_v61, 0.0  ;;  %v399_v61 = vld [vmem:[%s670_s5] sm:$0x1] }
 0x11b   :  { %v321_v63 = vsel %vm33_vm0, %v317_v60, 0.0  ;;  %v398_v60 = vld [vmem:[%s669_s4] sm:$0x1] }
 0x11c   :  { %v612_v20 = vpop.permute.xlu1 %360  ;;  %v324_v9 = vadd.f32 %v323_v4, %v321_v63 }
 0x14f   :  { %v86_v52 = vpop.xlane.xlu0 %85 }
 0x150   :  { %v90_v17 = vsel %vm33_vm0, %v86_v52, 0.0 }
 0x151   :  { %v91_v21 = vrot.slane %v90_v17, 4 }
 0x153   :  { %v110_v55 = vpop.xlane.xlu0 %109  ;;  %v92_v25 = vadd.f32 %v91_v21, %v90_v17 }
 0x154   :  { %v114_v16 = vsel %vm33_vm0, %v110_v55, 0.0  ;;  %v367_v55 = vsel %vm366_vm7, %v605_v50, %v612_v20  ;;  %v375_v50 = vsel %vm374_vm8, %v612_v20, 0.0 }
 0x155   :  { %v115_v18 = vrot.slane %v114_v16, 4  ;;  %v93_v30 = vrot.slane %v92_v25, 2 }
 0x157   :  { %v113_v59 = vpop.xlane.xlu0 %112  ;;  %v116_v23 = vadd.f32 %v115_v18, %v114_v16  ;;  %v94_v33 = vadd.f32 %v93_v30, %v92_v25 }
 0x158   :  { %v121_v22 = vsel %vm33_vm0, %v113_v59, 0.0 }
 0x159   :  { %v122_v26 = vrot.slane %v121_v22, 4  ;;  %v117_v27 = vrot.slane %v116_v23, 2  ;;  %v95_v3 = vrot.slane %v94_v33, 1 }
 0x15b   :  { %v89_v62 = vpop.xlane.xlu1 %88  ;;  %v307_v5 = vpop.permute.xlu0 %306  ;;  %v123_v31 = vadd.f32 %v122_v26, %v121_v22  ;;  %v118_v2 = vadd.f32 %v117_v27, %v116_v23  ;;  %v96_v6 = vadd.f32 %v95_v3, %v94_v33  ;;  %v416_v27 = vld [vmem:[%s671_s6] sm:$0x1] }
 0x15c   :  { %v97_v19 = vsel %vm33_vm0, %v89_v62, 0.0  ;;  %v373_v62 = vsel %vm33_vm0, %v367_v55, 0.0 }
 0x15d   :  { %v98_v24 = vrot.slane %v97_v19, 4  ;;  %v124_v1 = vrot.slane %v123_v31, 2  ;;  %v119_v34 = vrot.slane %v118_v2, 1  ;;  %v104_v42 = vmul.f32 0.00390625, %v96_v6 }
 0x15f   :  { %v309_v7 = vpop.permute.xlu1 %308  ;;  %v99_v28 = vadd.f32 %v98_v24, %v97_v19  ;;  %v125_v36 = vadd.f32 %v124_v1, %v123_v31  ;;  %v120_v37 = vadd.f32 %v119_v34, %v118_v2  ;;  %v154_v46 = vadd.f32 1e-06, %v104_v42 }
 0x160   :  { %v312_v8 = vsel %vm310_vm3, %v307_v5, %v309_v7  ;;  %v320_v11 = vsel %vm618_vm5, %v309_v7, 0.0 }
 0x161   :  { %v319_v10 = vsel %vm614_vm4, %v312_v8, 0.0  ;;  %v327_v14 = vsel %vm322_vm6, %v320_v11, 0.0  ;;  %v100_v32 = vrot.slane %v99_v28, 2  ;;  %v126_v39 = vrot.slane %v125_v36, 1 }
 0x162   :  { %v325_v12 = vsel %vm33_vm0, %v319_v10, 0.0  ;;  %v128_v40 = vmul.f32 0.00390625, %v120_v37  ;;  %v376_v10 = vadd.f32 %v375_v50, %v373_v62 }
 0x163   :  { %v326_v13 = vadd.f32 %v325_v12, %v324_v9  ;;  %v101_v35 = vadd.f32 %v100_v32, %v99_v28  ;;  %v127_v43 = vadd.f32 %v126_v39, %v125_v36  ;;  %v400_v9 = vsub.f32 %v398_v60, %v399_v61  ;;  %v417_v28 = vld [vmem:[%s672_s7] sm:$0x1] }
 0x164   :  { %v156_v44 = vadd.f32 1e-06, %v128_v40  ;;  %v418_v33 = vsub.f32 %v416_v27, %v417_v28 }
 0x165   :  { %v328_v15 = vadd.f32 %v327_v14, %v326_v13  ;;  %v102_v38 = vrot.slane %v101_v35, 1  ;;  %v129_v47 = vmul.f32 0.00390625, %v127_v43  ;;  %v401_v20 = vand.u32 2147483647, %v400_v9 }
 0x166   :  { %v158_v52 = vmul.f32 %v156_v44, %v154_v46  ;;  %v419_v3 = vand.u32 2147483647, %v418_v33 }
 0x167   :  { %329 = vadd.xlane.f32.xlu1 %v328_v15  ;;  %v103_v41 = vadd.f32 %v102_v38, %v101_v35  ;;  %v157_v29 = vadd.f32 1e-06, %v129_v47  ;;  %v403_v25 = vsel %vm402_vm9, %v401_v20, 0.0 }
 0x168   :  { %470 = vrsqrt.f32 %v158_v52  ;;  %v421_v37 = vsel %vm420_vm11, %v419_v3, 0.0 }
 0x169   :  { %v105_v45 = vmul.f32 0.00390625, %v103_v41 }
 0x16b   :  { %v155_v53 = vadd.f32 1e-06, %v105_v45 }
 0x16d   :  { %v159_v58 = vmul.f32 %v157_v29, %v155_v53 }
 0x16f   :  { %472 = vrsqrt.f32 %v159_v58 }
 0x172   :  { %v471_v23 = vpop.eup %470 }
 0x179   :  { %v473_v31 = vpop.eup %472 }
 0x18c   :  { %v134_v48 = vpop.xlane.xlu0 %133 }
 0x18d   :  { %v138_v49 = vsel %vm33_vm0, %v134_v48, 0.0 }
 0x18e   :  { %v139_v54 = vrot.slane %v138_v49, 4 }
 0x190   :  { %v140_v56 = vadd.f32 %v139_v54, %v138_v49  ;;  %v137_v57 = vpop.xlane.xlu1 %136  ;;  %v363_v5 = vpop.permute.xlu0 %362 }
 0x191   :  { %v145_v59 = vsel %vm33_vm0, %v137_v57, 0.0 }
 0x192   :  { %v141_v0 = vrot.slane %v140_v56, 2  ;;  %v146_v63 = vrot.slane %v145_v59, 4 }
 0x194   :  { %v142_v4 = vadd.f32 %v141_v0, %v140_v56  ;;  %v147_v7 = vadd.f32 %v146_v63, %v145_v59  ;;  %v365_v8 = vpop.permute.xlu1 %364 }
 0x195   :  { %v368_v12 = vsel %vm366_vm7, %v363_v5, %v365_v8  ;;  %v379_v18 = vsel %vm374_vm8, %v365_v8, 0.0 }
 0x196   :  { %v143_v11 = vrot.slane %v142_v4, 1  ;;  %v148_v13 = vrot.slane %v147_v7, 2  ;;  %v377_v14 = vsel %vm33_vm0, %v368_v12, 0.0 }
 0x197   :  { %v378_v16 = vadd.f32 %v377_v14, %v376_v10 }
 0x198   :  { %v144_v15 = vadd.f32 %v143_v11, %v142_v4  ;;  %v149_v17 = vadd.f32 %v148_v13, %v147_v7 }
 0x199   :  { %v380_v21 = vadd.f32 %v379_v18, %v378_v16 }
 0x19a   :  { %v152_v19 = vmul.f32 0.00390625, %v144_v15  ;;  %v150_v22 = vrot.slane %v149_v17, 1 }
 0x19b   :  { %381 = vadd.xlane.f32.xlu0 %v380_v21 }
 0x19c   :  { %v151_v24 = vadd.f32 %v150_v22, %v149_v17  ;;  %v162_v26 = vmul.f32 %v471_v23, %v152_v19 }
 0x19e   :  { %v153_v30 = vmul.f32 0.00390625, %v151_v24  ;;  %v164_v32 = vsub.f32 1.0, %v162_v26 }
 0x19f   :  { %404 = vadd.xlane.f32.xlu0 %v403_v25 }
 0x1a0   :  { %v163_v2 = vmul.f32 %v473_v31, %v153_v30  ;;  %v167_v34 = vsel %vm166_vm10, %v164_v32, 0.0 }
 0x1a2   :  { %v165_v1 = vsub.f32 1.0, %v163_v2 }
 0x1a4   :  { %v168_v35 = vsel %vm166_vm10, %v165_v1, 0.0 }
 0x1a5   :  { %v169_v36 = vadd.f32 %v168_v35, %v167_v34 }
 0x1a7   :  { %170 = vadd.xlane.f32.xlu0 %v169_v36 }
 0x1ab   :  { %422 = vadd.xlane.f32.xlu0 %v421_v37 }
 0x1f4   :  { %v330_v6 = vpop.xlane.xlu1 %329 }
 0x1f5   :  { %v331_v39 = vrot.slane %v330_v6, 4 }
 0x1f7   :  { %v332_v43 = vadd.f32 %v331_v39, %v330_v6 }
 0x1f9   :  { %v333_v46 = vrot.slane %v332_v43, 2 }
 0x1fb   :  { %v334_v54 = vadd.f32 %v333_v46, %v332_v43 }
 0x1fd   :  { %v335_v60 = vrot.slane %v334_v54, 1 }
 0x1ff   :  { %v336_v7 = vadd.f32 %v335_v60, %v334_v54 }
 0x228   :  { %v382_v38 = vpop.xlane.xlu0 %381 }
 0x229   :  { %v383_v41 = vrot.slane %v382_v38, 4 }
 0x22b   :  { %v384_v44 = vadd.f32 %v383_v41, %v382_v38 }
 0x22c   :  { %v405_v40 = vpop.xlane.xlu0 %404 }
 0x22d   :  { %v406_v42 = vrot.slane %v405_v40, 4  ;;  %v385_v48 = vrot.slane %v384_v44, 2 }
 0x22f   :  { %v407_v45 = vadd.f32 %v406_v42, %v405_v40  ;;  %v386_v57 = vadd.f32 %v385_v48, %v384_v44 }
 0x231   :  { %v408_v52 = vrot.slane %v407_v45, 2  ;;  %v387_v50 = vrot.slane %v386_v57, 1 }
 0x233   :  { %v409_v58 = vadd.f32 %v408_v52, %v407_v45  ;;  %v388_v8 = vadd.f32 %v387_v50, %v386_v57 }
 0x234   :  { %v171_v47 = vpop.xlane.xlu0 %170 }
 0x235   :  { %v172_v49 = vrot.slane %v171_v47, 4  ;;  %v410_v63 = vrot.slane %v409_v58, 1 }
 0x237   :  { %v173_v53 = vadd.f32 %v172_v49, %v171_v47  ;;  %v411_v10 = vadd.f32 %v410_v63, %v409_v58 }
 0x238   :  { %v423_v55 = vpop.xlane.xlu0 %422 }
 0x239   :  { %v174_v29 = vrot.slane %v173_v53, 2  ;;  %v424_v56 = vrot.slane %v423_v55, 4 }
 0x23b   :  { %v425_v0 = vadd.f32 %v424_v56, %v423_v55  ;;  %v175_v59 = vadd.f32 %v174_v29, %v173_v53 }
 0x23d   :  { %v426_v61 = vrot.slane %v425_v0, 2  ;;  %v176_v62 = vrot.slane %v175_v59, 1 }
 0x23f   :  { %v427_v4 = vadd.f32 %v426_v61, %v425_v0  ;;  %v177_v5 = vadd.f32 %v176_v62, %v175_v59 }
 0x241   :  { %455 = vpush %v177_v5  ;;  %v428_v9 = vrot.slane %v427_v4, 1 }
 0x242   :  { %457 = vpush %v336_v7 }
 0x243   :  { %459 = vpush %v388_v8  ;;  %v429_v11 = vadd.f32 %v428_v9, %v427_v4 }
 0x244   :  { %461 = vpush %v411_v10 }
 0x245   :  { %463 = vpush %v429_v11 }
 0x272   :  { %s456_s6 = spop %455 }
 0x273   :  { %s458_s7 = spop %457  ;;  %s437_s14 = smul.f32 10.0, %s456_s6  ;;  %v446_v14 = vstv %s456_s6 }
 0x274   :  { %s392_s27 = smul.f32 0.0010416667, %s458_s7  ;;  %s460_s28 = spop %459 }
 0x275   :  { %s395_s29 = smul.f32 0.0010416667, %s460_s28  ;;  %s462_s30 = spop %461 }
 0x276   :  { %s415_s9 = smul.f32 0.0078125, %s462_s30  ;;  %s464_s10 = spop %463 }
 0x277   :  { %s396_s11 = sadd.f32 %s395_s29, %s392_s27  ;;  %s433_s12 = smul.f32 0.03125, %s464_s10 }
 0x278   :  { %s434_s1 = smul.f32 3.2, %s415_s9 }
 0x279   :  { %s397_s13 = smul.f32 0.5, %s396_s11 }
 0x27a   :  { %s435_s0 = smul.f32 0.8, %s433_s12 }
 0x27b   :  { %v444_v12 = vstv %s397_s13  ;;  %s439_s16 = smul.f32 15.0, %s397_s13 }
 0x27c   :  { %s436_s15 = sadd.f32 %s435_s0, %s434_s1  ;;  %v445_v13 = vsel %vm443_vm12, %v444_v12, 0.0 }
 0x27d   :  { %v447_v15 = vsel %vm442_vm13, %v446_v14, %v445_v13 }
 0x27e   :  { %s438_s17 = sadd.f32 %s437_s14, %s436_s15 }
 0x280   :  { %s440_s18 = sadd.f32 %s439_s16, %s438_s17 }
 0x282   :  { %v448_v16 = vstv %s440_s18 }
 0x283   :  { %v449_v17 = vsel %vm441_vm14, %v448_v16, %v447_v15 }
 0x284   :  { %450 = vst [vmem:[%s673_s8] sm:$0x1] %v449_v17 }

</bundles_post_ra>
